<compile_context>
chip_gen: v7x
topology: tpu7x:2x2x1
jax: 0.10.0
libtpu: 0.0.40
codegen_flags: <defaults>
</compile_context>

<pallas_src>
import jax
import jax.numpy as jnp
from jax import lax
from jax.experimental import pallas as pl
from jax.experimental.pallas import tpu as pltpu

T = 4  # module-level `t` from the PyTorch file


def multi_atten_kernel(x_ref, wt_ref, bw_ref, vblk_ref, c_ref, out_ref):
    block_b, HD = out_ref.shape            # output block: (block_b, H*D)
    BN, D = x_ref.shape                    # x block: (block_b*N, D)
    N = BN // block_b
    H = c_ref.shape[1]

    x_f32 = x_ref[...]                     # (block_b*N, D) f32 (native dtype)
    x_bf = x_f32.astype(jnp.bfloat16)      # on-chip cast for the MXU

    # Fused first linear of ALL heads for the whole batch tile (one tall MXU matmul).
    h = jnp.tanh(
        jnp.dot(x_bf, wt_ref[...], preferred_element_type=jnp.float32)
        + bw_ref[...]
    )                                                          # (block_b*N, H*L) f32

    # Per-head scores via the block-diagonal v matrix (bf16 MXU, f32 acc) + bias c.
    s = jnp.dot(h.astype(jnp.bfloat16), vblk_ref[...],
                preferred_element_type=jnp.float32) + c_ref[...]   # (block_b*N, H) f32

    # Vectorized softmax over the sequence axis for the whole batch tile.
    s3 = s.reshape(block_b, N, H)
    m = jnp.max(s3, axis=1, keepdims=True)                     # (block_b, 1, H)
    p = jnp.exp(s3 - m)                                        # (block_b, N, H) f32
    denom = jnp.sum(p, axis=1, keepdims=True)                  # (block_b, 1, H)

    # Batched attention pooling on the MXU (f32 x, f32 accumulation).
    x3 = x_f32.reshape(block_b, N, D)
    pooled = jnp.einsum("bnh,bnd->bhd", p, x3,
                        preferred_element_type=jnp.float32)    # (block_b, H, D)

    # Exact normalization in f32 (attention weights sum to 1 exactly).
    pooled = pooled / jnp.swapaxes(denom, 1, 2)                # (block_b, H, D)

    # Single lane-dense store of the whole tile.
    out_ref[...] = pooled.reshape(block_b, HD).astype(out_ref.dtype)


def _vmem_capacity_bytes():
    try:
        info = pltpu.get_tpu_info()
        cap = getattr(info, "vmem_capacity_bytes", None)
        if cap:
            return int(cap)
    except Exception:
        pass
    return 64 * 1024 * 1024  # conservative (v7x-sized)


def _pick_block_b(B, N, D, vmem_cap):
    """Largest batch tile that divides B, respects (8,128) layout rules on both the
    x block and the (block_b, H*D) output block, and whose padded f32 x tile fits
    the generation-aware VMEM budget.  On small-VMEM parts (v7x) prefer >= 2 grid
    steps so the batch axis can be sharded across both TensorCores."""
    lanes_D = max(((D + 127) // 128) * 128, 128)

    def x_tile_bytes(bb):
        rows = bb * N
        rows_pad = ((rows + 7) // 8) * 8
        return rows_pad * lanes_D * 4          # x streamed as f32

    big_vmem = vmem_cap >= 100 * 1024 * 1024   # v5e / v6e (128 MiB)
    budget = (24 if big_vmem else 10) * 1024 * 1024  # per buffer (x2 double-buffered)

    def ok_layout(bb):
        rows_ok = ((bb * N) % 8 == 0) or (bb == B)   # x block sublane rule (f32)
        out_ok = (bb % 8 == 0) or (bb == B)          # output block sublane rule
        return rows_ok and out_ok

    candidates = [c for c in range(B, 0, -1)
                  if B % c == 0 and ok_layout(c) and x_tile_bytes(c) <= budget]
    if not candidates:
        candidates = [c for c in range(B, 0, -1) if B % c == 0 and ok_layout(c)]

    if not big_vmem:  # v7x: keep the grid >= 2 steps when layout rules allow it
        multi = [c for c in candidates if c <= B // 2]
        if multi:
            return multi[0], budget
    return candidates[0], budget


def multi_atten(x, w, bw, v, c, *, block_b=None):
    """x: (B, N, D); w: (H, L, D); bw/v: (H, 1, L); c: (H, 1, 1).
    Returns (B, H*D), matching torch.concatenate([head_i(x)], dim=1)."""
    B, N, D = x.shape
    H, L, _ = w.shape
    K = H * L

    vmem_cap = _vmem_capacity_bytes()
    if block_b is None:
        block_b, _ = _pick_block_b(B, N, D, vmem_cap)
    assert B % block_b == 0
    vmem_limit = (64 if vmem_cap >= 100 * 1024 * 1024 else 48) * 1024 * 1024

    # Wrapper-side packing (tiny, done once).  x stays in its native f32.
    xf = x.reshape(B * N, D)                                          # flat x (f32)
    wt = w.transpose(2, 0, 1).reshape(D, K).astype(jnp.bfloat16)      # stacked W^T
    bwf = bw.reshape(1, K).astype(jnp.float32)                        # stacked bias
    vf = v.reshape(H, L).astype(jnp.float32)
    vblk = (vf[:, :, None] * jnp.eye(H, dtype=jnp.float32)[:, None, :]) \
        .reshape(K, H).astype(jnp.bfloat16)                           # block-diag v
    cf = c.reshape(1, H).astype(jnp.float32)                          # per-head c

    itemsize = jnp.dtype(x.dtype).itemsize
    cost = pl.CostEstimate(
        flops=2 * B * N * D * K + 2 * B * N * K * H + 2 * B * N * H * D,
        transcendentals=B * N * K + B * N * H,
        bytes_accessed=B * N * D * itemsize + B * H * D * itemsize
        + D * K * 2 + K * 4 + K * H * 2 + H * 4,
    )

    out = pl.pallas_call(
        multi_atten_kernel,
        out_shape=jax.ShapeDtypeStruct((B, H * D), x.dtype),
        grid_spec=pltpu.PrefetchScalarGridSpec(
            num_scalar_prefetch=0,
            grid=(B // block_b,),
            in_specs=[
                pl.BlockSpec((block_b * N, D), lambda i: (i, 0)),  # x: read once/tile
                pl.BlockSpec((D, K), lambda i: (0, 0)),            # stacked W^T (inv.)
                pl.BlockSpec((1, K), lambda i: (0, 0)),            # stacked bias
                pl.BlockSpec((K, H), lambda i: (0, 0)),            # block-diagonal v
                pl.BlockSpec((1, H), lambda i: (0, 0)),            # per-head c
            ],
            out_specs=pl.BlockSpec((block_b, H * D), lambda i: (i, 0)),
        ),
        compiler_params=pltpu.CompilerParams(
            dimension_semantics=("parallel",),
            vmem_limit_bytes=vmem_limit),
        cost_estimate=cost,
    )(xf, wt, bwf, vblk, cf)

    return out  # already (B, H*D) == torch concat of heads along dim=1


def multi_atten_ref(x, w, bw, v, c):
    """Pure-JAX reference mirroring the PyTorch forward (f32)."""
    outs = []
    for h in range(w.shape[0]):
        a = jnp.tanh(jnp.einsum("bnd,ld->bnl", x, w[h]) + bw[h, 0])   # (B,N,L)
        s = jnp.einsum("bnl,l->bn", a, v[h, 0]) + c[h, 0, 0]           # (B,N)
        att = jax.nn.softmax(s, axis=1)                                # (B,N)
        outs.append(jnp.einsum("bn,bnd->bd", att, x))                  # (B,D)
    return jnp.concatenate(outs, axis=1)


if __name__ == "__main__":
    # Small shapes consistent with the module: num_head=2, oc_filter=4 -> L=16,
    # input_dim=32, batch=2, sequence=8.
    num_head = 2
    oc_filter = 4
    L = oc_filter * T          # 16
    D = 32                     # input_dim
    B, N = 2, 8

    key = jax.random.PRNGKey(0)
    kx, kw, kbw, kv, kc = jax.random.split(key, 5)
    x = jax.random.normal(kx, (B, N, D), dtype=jnp.float32)
    w = 0.1 * jax.random.normal(kw, (num_head, L, D), dtype=jnp.float32)
    bw = 0.1 * jax.random.normal(kbw, (num_head, 1, L), dtype=jnp.float32)
    v = 0.1 * jax.random.normal(kv, (num_head, 1, L), dtype=jnp.float32)
    c = 0.1 * jax.random.normal(kc, (num_head, 1, 1), dtype=jnp.float32)

    out = jax.block_until_ready(multi_atten(x, w, bw, v, c))
    ref = jax.block_until_ready(multi_atten_ref(x, w, bw, v, c))

    assert out.shape == (B, num_head * D), out.shape
    # bf16 MXU inputs for the two small matmuls (f32 accumulation, f32 softmax and
    # f32 pooling with exact normalization) -> modest tolerance.
    assert jnp.allclose(out, ref, atol=2e-2, rtol=2e-2), "mismatch vs reference"
    print("KERNEL_OK")
</pallas_src>

<mosaic_0001>
module attributes {stable_mosaic.version = 11 : i64} {
  func.func @multi_atten_kernel(%arg0: i32, %arg1: memref<16x32xf32, #tpu.memory_space<vmem>>, %arg2: memref<32x32xbf16, #tpu.memory_space<vmem>>, %arg3: memref<1x32xf32, #tpu.memory_space<vmem>>, %arg4: memref<32x2xbf16, #tpu.memory_space<vmem>>, %arg5: memref<1x2xf32, #tpu.memory_space<vmem>>, %arg6: memref<2x64xf32, #tpu.memory_space<vmem>>) attributes {dimension_semantics = [#tpu.dimension_semantics<parallel>], iteration_bounds = array<i64: 1>, scalar_prefetch = 0 : i64, scratch_operands = 0 : i64, tpu.core_type = #tpu.core_type<tc>, window_params = [{transform_indices = @transform_0, window_bounds = array<i64: 16, 32>}, {pipeline_mode = #tpu.pipeline_mode<synchronous>, transform_indices = @transform_1, window_bounds = array<i64: 32, 32>}, {pipeline_mode = #tpu.pipeline_mode<synchronous>, transform_indices = @transform_2, window_bounds = array<i64: 1, 32>}, {pipeline_mode = #tpu.pipeline_mode<synchronous>, transform_indices = @transform_3, window_bounds = array<i64: 32, 2>}, {pipeline_mode = #tpu.pipeline_mode<synchronous>, transform_indices = @transform_4, window_bounds = array<i64: 1, 2>}, {transform_indices = @transform_5, window_bounds = array<i64: 2, 64>}]} {
    %c0 = arith.constant 0 : index
    %c0_0 = arith.constant 0 : index
    %0 = vector.load %arg1[%c0, %c0_0] : memref<16x32xf32, #tpu.memory_space<vmem>>, vector<16x32xf32>
    %1 = arith.truncf %0 : vector<16x32xf32> to vector<16x32xbf16>
    %c0_1 = arith.constant 0 : index
    %c0_2 = arith.constant 0 : index
    %2 = vector.load %arg2[%c0_1, %c0_2] : memref<32x32xbf16, #tpu.memory_space<vmem>>, vector<32x32xbf16>
    %cst = arith.constant dense<0.000000e+00> : vector<16x32xf32>
    %3 = tpu.matmul %1, %2, %cst {dimension_numbers = #tpu.dot_dimension_numbers<[1], [0], [0], [1], [0, 0, 1, 1], [], []>} : vector<16x32xbf16>, vector<32x32xbf16>, vector<16x32xf32> -> vector<16x32xf32>
    %c0_3 = arith.constant 0 : index
    %c0_4 = arith.constant 0 : index
    %4 = vector.load %arg3[%c0_3, %c0_4] : memref<1x32xf32, #tpu.memory_space<vmem>>, vector<1x32xf32>
    %5 = vector.broadcast %4 : vector<1x32xf32> to vector<16x32xf32>
    %6 = arith.addf %3, %5 : vector<16x32xf32>
    %7 = math.tanh %6 : vector<16x32xf32>
    %8 = arith.truncf %7 : vector<16x32xf32> to vector<16x32xbf16>
    %c0_5 = arith.constant 0 : index
    %c0_6 = arith.constant 0 : index
    %9 = vector.load %arg4[%c0_5, %c0_6] : memref<32x2xbf16, #tpu.memory_space<vmem>>, vector<32x2xbf16>
    %cst_7 = arith.constant dense<0.000000e+00> : vector<16x2xf32>
    %10 = tpu.matmul %8, %9, %cst_7 {dimension_numbers = #tpu.dot_dimension_numbers<[1], [0], [0], [1], [0, 0, 1, 1], [], []>} : vector<16x32xbf16>, vector<32x2xbf16>, vector<16x2xf32> -> vector<16x2xf32>
    %c0_8 = arith.constant 0 : index
    %c0_9 = arith.constant 0 : index
    %11 = vector.load %arg5[%c0_8, %c0_9] : memref<1x2xf32, #tpu.memory_space<vmem>>, vector<1x2xf32>
    %12 = vector.broadcast %11 : vector<1x2xf32> to vector<16x2xf32>
    %13 = arith.addf %10, %12 : vector<16x2xf32>
    %14 = vector.shape_cast %13 : vector<16x2xf32> to vector<2x8x2xf32>
    %cst_10 = arith.constant dense<0xFF800000> : vector<2x2xf32>
    %15 = vector.multi_reduction <maximumf>, %14, %cst_10 [1] : vector<2x8x2xf32> to vector<2x2xf32>
    %16 = vector.shape_cast %15 : vector<2x2xf32> to vector<2x1x2xf32>
    %17 = vector.broadcast %16 : vector<2x1x2xf32> to vector<2x8x2xf32>
    %18 = arith.subf %14, %17 : vector<2x8x2xf32>
    %19 = math.exp %18 : vector<2x8x2xf32>
    %cst_11 = arith.constant dense<0.000000e+00> : vector<2x2xf32>
    %20 = vector.multi_reduction <add>, %19, %cst_11 [1] : vector<2x8x2xf32> to vector<2x2xf32>
    %21 = vector.shape_cast %20 : vector<2x2xf32> to vector<2x1x2xf32>
    %22 = vector.shape_cast %0 : vector<16x32xf32> to vector<2x8x32xf32>
    "tpu.trace_start"() <{level = 10 : i32, message = "bnh,bnd->bhd"}> : () -> ()
    %cst_12 = arith.constant dense<0.000000e+00> : vector<2x2x32xf32>
    %23 = tpu.matmul %19, %22, %cst_12 {dimension_numbers = #tpu.dot_dimension_numbers<[1], [1], [2], [2], [0, 0, 0, 2, 1, 2], [0], [0]>} : vector<2x8x2xf32>, vector<2x8x32xf32>, vector<2x2x32xf32> -> vector<2x2x32xf32>
    "tpu.trace_stop"() : () -> ()
    %24 = tpu.transpose %21, [0, 2, 1] : vector<2x1x2xf32> -> vector<2x2x1xf32>
    %25 = vector.broadcast %24 : vector<2x2x1xf32> to vector<2x2x32xf32>
    %26 = arith.divf %23, %25 : vector<2x2x32xf32>
    %27 = vector.shape_cast %26 : vector<2x2x32xf32> to vector<2x64xf32>
    %c0_13 = arith.constant 0 : index
    %c0_14 = arith.constant 0 : index
    %28 = vector.load %arg6[%c0_13, %c0_14] : memref<2x64xf32, #tpu.memory_space<vmem>>, vector<2x64xf32>
    tpu.vector_store %arg6[%c0_13, %c0_14], %27 {strides = array<i32>} : memref<2x64xf32, #tpu.memory_space<vmem>>, vector<2x64xf32>,
    return
  }
  func.func @transform_0(%arg0: i32) -> (i32, i32) {
    %c0_i32 = arith.constant 0 : i32
    %c0_i32_0 = arith.constant 0 : i32
    return %arg0, %c0_i32 : i32, i32
  }
  func.func @transform_1(%arg0: i32) -> (i32, i32) {
    %c0_i32 = arith.constant 0 : i32
    %c0_i32_0 = arith.constant 0 : i32
    %c0_i32_1 = arith.constant 0 : i32
    return %c0_i32, %c0_i32_0 : i32, i32
  }
  func.func @transform_2(%arg0: i32) -> (i32, i32) {
    %c0_i32 = arith.constant 0 : i32
    %c0_i32_0 = arith.constant 0 : i32
    %c0_i32_1 = arith.constant 0 : i32
    return %c0_i32, %c0_i32_0 : i32, i32
  }
  func.func @transform_3(%arg0: i32) -> (i32, i32) {
    %c0_i32 = arith.constant 0 : i32
    %c0_i32_0 = arith.constant 0 : i32
    %c0_i32_1 = arith.constant 0 : i32
    return %c0_i32, %c0_i32_0 : i32, i32
  }
  func.func @transform_4(%arg0: i32) -> (i32, i32) {
    %c0_i32 = arith.constant 0 : i32
    %c0_i32_0 = arith.constant 0 : i32
    %c0_i32_1 = arith.constant 0 : i32
    return %c0_i32, %c0_i32_0 : i32, i32
  }
  func.func @transform_5(%arg0: i32) -> (i32, i32) {
    %c0_i32 = arith.constant 0 : i32
    %c0_i32_0 = arith.constant 0 : i32
    return %arg0, %c0_i32 : i32, i32
  }
}

</mosaic_0001>

<bundles_post_ra>
// kernel: tpu_custom_call.1
= control target key start
LH: loop header
LB: loop body
LE: loop exit
PB: predicated region body
PF: predicated region fallthrough
CT: control target
= control target key end

     0   :  { %10 = vsyncpa [#allocation3], 0  ;;  %s756_s0 = inlined_call_operand.vmem [shape: f32[16,32], index: 0, kind: input, shape index: {}]   ;;  %s757_s1 = inlined_call_operand.hbm [shape: bf16[32,32], index: 1, kind: input, shape index: {}]   ;;  %s758_s2 = inlined_call_operand.vmem [shape: f32[1,32], index: 2, kind: input, shape index: {}]   ;;  %s759_s3 = inlined_call_operand.vmem [shape: bf16[32,2], index: 3, kind: input, shape index: {}]   ;;  %s760_s4 = inlined_call_operand.vmem [shape: f32[1,2], index: 4, kind: input, shape index: {}]   ;;  %s761_s5 = inlined_call_operand.hbm [shape: f32[2,64], index: 5, kind: output, shape index: {}]  }
   0x1   :  { %11 = vsyncpa [#allocation4], 0  ;;  %s653_s18 = smov [#allocation2]   ;;  %s605_s22 = scalar_lea.hbm %s757_s1, 256 }
   0x2   :  { %s19_s19 = sshll.u32 %s653_s18, 4  ;;  %p606_p0 = scmp.ne.s32.totalorder %s757_s1, %s605_s22  ;;  %s20_s19 = int_to_ptr.vmem [resolvable:$true] %s19_s19 }
   0x3   :  { %p609_p1 = scmp.lt.u32.totalorder %s605_s22, %s757_s1 }
   0x5   :  { %p611_p2 = pnand %p609_p1, %p606_p0 }
   0x7   :  { %614 = shalt.err (!%p611_p2)
}
   0x8   :  { %s615_s27 = scalar_lea.vmem %s20_s19, 256  ;;  %p620_p4 = scmp.lt.s32.totalorder %s20_s19, %s20_s19 }
   0x9   :  { %p616_p3 = scmp.ne.s32.totalorder %s20_s19, %s615_s27  ;;  %p621_p5 = scmp.lt.s32.totalorder %s615_s27, %s615_s27 }
   0xb   :  { %p622_p6 = por %p621_p5, %p620_p4 }
   0xd   :  { %p623_p7 = pnand %p622_p6, %p616_p3 }
   0xf   :  { %626 = shalt.err (!%p623_p7)
}
  0x10   :  { %s654_s28 = smov 64   ;;  %s655_s29 = smov 4  }
  0x11   :  { %25 = dma.hbm_to_vmem [thread:$0]  %s757_s1, 256, %s20_s19, [#allocation3], %s654_s28, %s654_s28, %s655_s29  }
  0x12   :  { %649 = dma.done.wait [#allocation3], 256  }
  0x13   :  { %650 = vsyncadd [#allocation3], 4294967040  ;;  %v656_v0 = vmov 0.0   ;;  %vm657_vm0 = vmmov 0   ;;  %v589_v1 = vld [vmem:[#allocation2] sm:$0xff]   ;;  %v590_v2 = vld [vmem:[#allocation2 + $0x8] sm:$0xff]  }
  0x14   :  { %552 = vmatprep.subr.bf16.mxu0 %v656_v0  ;;  %556 = vmatprep.mubr.msk.bf16.mxu0 %vm657_vm0, %v656_v0  ;;  %v36_v3 = vld [vmem:[%s756_s0] sm:$0xff]  ;;  %v37_v4 = vld [vmem:[%s756_s0 + $0x8] sm:$0xff]  ;;  %vm62_vm1 = vcmask 261120   ;;  %vm177_vm2 = vcmask 15360   ;;  %v658_v59 = vmov 0   ;;  %vm244_vm3 = vcmask 64512  }
  0x15   :  { %560 = vmatprep.subr.bf16.mxu1 %v656_v0  ;;  %564 = vmatprep.mubr.msk.bf16.mxu1 %vm657_vm0, %v656_v0  ;;  %v38_v5 = vpack.c.bf16 %v37_v4, %v36_v3  ;;  %v591_v6 = vld [vmem:[%s759_s3] sm:$0xff]   ;;  %v592_v7 = vld [vmem:[%s759_s3 + $0x8] sm:$0xff]   ;;  %vm515_vm4 = vcmask 517120  }
  0x16   :  { %553 = vmatpush3.bf16.msra.mxu0 %v589_v1  ;;  %561 = vmatpush3.bf16.msra.mxu1 %v591_v6  ;;  %v532_v8 = vld [vmem:[%s758_s2] ss:$0 sm:$0xff]  ;;  %s660_s2 = smov 32  }
  0x17   :  { %554 = vmatprep.subr.bf16.mxu0 %v656_v0  ;;  %562 = vmatprep.subr.bf16.mxu1 %v656_v0  ;;  %v536_v18 = vld [vmem:[%s760_s4] ss:$0 sm:$0xff]  ;;  %s661_s4 = smov [#allocation5]  }
  0x18   :  { %s523_s16 = sshll.u32 %s661_s4, 4  ;;  %s524_s16 = int_to_ptr.vmem [resolvable:$true] %s523_s16 }
  0x19   :  { %s627_s17 = scalar_lea.vmem %s524_s16, 32  ;;  %p632_p9 = scmp.lt.s32.totalorder %s524_s16, %s524_s16 }
  0x1a   :  { %555 = vmatpush3.bf16.msra.mxu0 %v590_v2  ;;  %563 = vmatpush3.bf16.msra.mxu1 %v592_v7  ;;  %p628_p8 = scmp.ne.s32.totalorder %s524_s16, %s627_s17  ;;  %p633_p10 = scmp.lt.s32.totalorder %s627_s17, %s627_s17 }
  0x1b   :  { %568 = vmatprep.subr.mxu0 %v656_v0  ;;  %573 = vmatprep.subr.mxu1 %v656_v0 }
  0x1c   :  { %p634_p11 = por %p633_p10, %p632_p9 }
  0x1d   :  { %557 = vmatmul.mubr.msk.bf16.vlgmr.msra.gmra.mrb[0].mxu0 %vm62_vm1, %v38_v5  ;;  %v505_v5 = vlaneseq }
  0x1e   :  { %569 = vmatpush3.msra.mxu0 %v36_v3  ;;  %570 = vmatprep.mubr.msk.f32.mxu0 %vm657_vm0, %v656_v0  ;;  %v659_v3 = vmov 1934713408   ;;  %p635_p12 = pnand %p634_p11, %p628_p8 }
  0xf0   :  { %v100_v9 = vpop.f32.mrb[0].mxu0 }
  0xf1   :  { %v101_v10 = vadd.f32 %v532_v8, %v100_v9  ;;  %v558_v11 = vpop.f32.mrb[1].mxu0 }
  0xf2   :  { %v103_v12 = vpop.f32.mrb[2].mxu0 }
  0xf3   :  { %v104_v13 = vadd.f32 %v532_v8, %v103_v12  ;;  %v559_v14 = vpop.f32.mrb[3].mxu0  ;;  %593 = vtanh.f32 %v101_v10  ;;  %v506_v10 = vshrl.u32 %v505_v5, 7 }
  0xf5   :  { %595 = vtanh.f32 %v104_v13 }
  0xfd   :  { %v594_v15 = vpop.eup %593 }
  0xff   :  { %v596_v16 = vpop.eup %595 }
 0x100   :  { %v109_v17 = vpack.c.bf16 %v596_v16, %v594_v15 }
 0x102   :  { %565 = vmatmul.mubr.msk.bf16.vlgmr.msra.gmra.mrb[0].mxu1 %vm62_vm1, %v109_v17 }
 0x103   :  { %574 = vmatpush3.msra.mxu1 %v37_v4  ;;  %575 = vmatprep.mubr.msk.f32.mxu1 %vm657_vm0, %v656_v0  ;;  %v503_v4 = vunpack.c.l.s4 %v659_v3 }
 0x105   :  { %v504_v9 = vunpack.c.0.s8 %v503_v4 }
 0x107   :  { %v507_v15 = vsub.s32 %v504_v9, %v506_v10 }
 0x1d5   :  { %v170_v19 = vpop.f32.mrb[0].mxu1 }
 0x1d6   :  { %v171_v20 = vadd.f32 %v536_v18, %v170_v19  ;;  %v566_v21 = vpop.f32.mrb[1].mxu1 }
 0x1d7   :  { %v173_v22 = vpop.f32.mrb[2].mxu1 }
 0x1d8   :  { %v178_v23 = vsel %vm177_vm2, %v171_v20, -inf  ;;  %v174_v24 = vadd.f32 %v536_v18, %v173_v22  ;;  %v567_v25 = vpop.f32.mrb[3].mxu1 }
 0x1d9   :  { %v179_v26 = vrot.slane %v178_v23, 4 }
 0x1da   :  { %v185_v27 = vsel %vm177_vm2, %v174_v24, -inf }
 0x1db   :  { %v180_v28 = vmax.f32 %v178_v23, %v179_v26  ;;  %v186_v29 = vrot.slane %v185_v27, 4 }
 0x1dd   :  { %v181_v30 = vrot.slane %v180_v28, 2  ;;  %v187_v31 = vmax.f32 %v185_v27, %v186_v29 }
 0x1df   :  { %v182_v32 = vmax.f32 %v180_v28, %v181_v30  ;;  %v188_v33 = vrot.slane %v187_v31, 2 }
 0x1e1   :  { %v183_v34 = vrot.slane %v182_v32, 1  ;;  %v189_v35 = vmax.f32 %v187_v31, %v188_v33 }
 0x1e3   :  { %v184_v36 = vmax.f32 %v182_v32, %v183_v34  ;;  %v190_v37 = vrot.slane %v189_v35, 1 }
 0x1e5   :  { %v192_v38 = vsub.f32 %v171_v20, %v184_v36  ;;  %v191_v39 = vmax.f32 %v189_v35, %v190_v37 }
 0x1e7   :  { %v194_v40 = vmul.f32 1.442695, %v192_v38  ;;  %v193_v41 = vsub.f32 %v174_v24, %v191_v39 }
 0x1e9   :  { %597 = vpow2.f32 %v194_v40  ;;  %v196_v42 = vmul.f32 1.442695, %v193_v41 }
 0x1eb   :  { %599 = vpow2.f32 %v196_v42 }
 0x1f3   :  { %v598_v43 = vpop.eup %597 }
 0x1f4   :  { %212 = vxpose.xlu0.b32.start.end [1/1] (short) (narrow) %v598_v43, 8  ;;  %v198_v44 = vsel %vm177_vm2, %v598_v43, 0.0 }
 0x1f5   :  { %v600_v45 = vpop.eup %599  ;;  %v199_v46 = vrot.slane %v198_v44, 4 }
 0x1f6   :  { %v205_v47 = vsel %vm177_vm2, %v600_v45, 0.0 }
 0x1f7   :  { %v200_v48 = vadd.f32 %v199_v46, %v198_v44  ;;  %v206_v49 = vrot.slane %v205_v47, 4 }
 0x1f8   :  { %318 = vxpose.xlu0.b32.start.end [1/1] (short) (narrow) %v600_v45, 8 }
 0x1f9   :  { %v201_v50 = vrot.slane %v200_v48, 2  ;;  %v207_v51 = vadd.f32 %v206_v49, %v205_v47 }
 0x1fb   :  { %v202_v52 = vadd.f32 %v201_v50, %v200_v48  ;;  %v208_v53 = vrot.slane %v207_v51, 2 }
 0x1fd   :  { %v203_v54 = vrot.slane %v202_v52, 1  ;;  %v209_v55 = vadd.f32 %v208_v53, %v207_v51 }
 0x1ff   :  { %v204_v56 = vadd.f32 %v203_v54, %v202_v52  ;;  %v210_v57 = vrot.slane %v209_v55, 1 }
 0x201   :  { %423 = vxpose.xlu1.b32.start.end [1/1] (short) (narrow) %v204_v56, 8  ;;  %v211_v58 = vadd.f32 %v210_v57, %v209_v55 }
 0x205   :  { %455 = vxpose.xlu1.b32.start.end [1/1] (short) (narrow) %v211_v58, 8 }
 0x221   :  { %587 = vset.pattern.permute.xlu0 %v658_v59 }
 0x223   :  { %588 = vset.pattern.permute.xlu1 %v658_v59 }
 0x274   :  { %v228_v60 = vpop.trf.xlu0 }
 0x275   :  { %571 = vmatmul.mubr.msk.f32.vlgmr.msra.gmra.mrb[4].mxu0 %vm244_vm3, %v228_v60 }
 0x278   :  { %v334_v61 = vpop.trf.xlu0 }
 0x279   :  { %576 = vmatmul.mubr.msk.f32.vlgmr.msra.gmra.mrb[4].mxu1 %vm244_vm3, %v334_v61 }
 0x281   :  { %v439_v62 = vpop.trf.xlu1 }
 0x282   :  { %489 = vperm.xlu0 %587, %v439_v62  }
 0x285   :  { %v471_v63 = vpop.trf.xlu1 }
 0x286   :  { %494 = vperm.xlu1 %588, %v471_v63  }
 0x301   :  { %v490_v1 = vpop.permute.xlu0 %489 }
 0x302   :  { %601 = vrcp.f32 %v490_v1 }
 0x305   :  { %v495_v2 = vpop.permute.xlu1 %494 }
 0x306   :  { %603 = vrcp.f32 %v495_v2 }
 0x30c   :  { %v602_v7 = vpop.eup %601 }
 0x310   :  { %v604_v11 = vpop.eup %603 }
 0x348   :  { %v314_v6 = vpop.f32.mrb[4].mxu0 }
 0x349   :  { %v572_v8 = vpop.f32.mrb[5].mxu0  ;;  %v498_v13 = vmul.f32 %v602_v7, %v314_v6 }
 0x34c   :  { %v419_v12 = vpop.f32.mrb[4].mxu1 }
 0x34d   :  { %v500_v14 = vmul.f32 %v604_v11, %v419_v12  ;;  %v577_v16 = vpop.f32.mrb[5].mxu1 }
 0x34f   :  { %v501_v17 = vcombine.low %v498_v13, %v500_v14 }
 0x351   :  { %v508_v18 = vrot.slane %v501_v17, %v507_v15 }
 0x353   :  { %v509_v19 = vcombine.high %v508_v18, %v656_v0 }
 0x355   :  { %511 = vrot.lane.b32.xlu1 %v509_v19, %s660_s2 }
 0x3c7   :  { %v512_v20 = vpop.permute.xlu1 %511 }
 0x3c8   :  { %v514_v21 = vsel %vm62_vm1, %v508_v18, %v512_v20 }
 0x3c9   :  { %516 = vst.msk [vmem:[#allocation5] sm:$0x3] %vm515_vm4, %v514_v21 }
 0x3ca   :  { %638 = shalt.err (!%p635_p12)
}
 0x3cb   :  { %s639_s20 = scalar_lea.hbm %s761_s5, 32 }
 0x3cc   :  { %p640_p13 = scmp.ne.s32.totalorder %s761_s5, %s639_s20  ;;  %p643_p0 = scmp.lt.u32.totalorder %s639_s20, %s761_s5 }
 0x3ce   :  { %p645_p1 = pnand %p643_p0, %p640_p13 }
 0x3d0   :  { %648 = shalt.err (!%p645_p1)
}
 0x3d1   :  { %526 = dma.vmem_to_hbm [thread:$0]  %s524_s16, 32, %s761_s5, [#allocation4]  }
 0x3d2   :  { %651 = dma.done.wait [#allocation4], 32  }
 0x3d3   :  { %652 = vsyncadd [#allocation4], 4294967264 }
 0x3d4   :  { %530 = vsyncpa [#allocation3], 1 }
 0x3d5   :  { %531 = vsyncpa [#allocation4], 1 }

</bundles_post_ra>
